<compile_context>
chip_gen: v7x
topology: tpu7x:2x2x1
jax: 0.10.0
libtpu: 0.0.40
codegen_flags: <defaults>
</compile_context>

<pallas_src>
import math
from functools import lru_cache, partial

import jax
import jax.numpy as jnp
from jax.experimental import pallas as pl
from jax.experimental.pallas import tpu as pltpu


def _round_up(n, m):
    return pl.cdiv(n, m) * m


def _rel_pos_emb_kernel(inv_freq_ref, phase_ref, sin_row_ref, cos_row_ref, out_ref,
                        *, x1_built, tile_global_rows):
    """Fill one (tile_rows_packed, dp) lane-dense tile of the rel-pos table.

    Global (unpacked) row g encodes relative position p = (x1_built - 1) - g; column c
    holds sin(p * w_c + phase_c) with phase_c = pi/2 on odd (cos) columns.  With
        base = (x1_built - 1 - tile_start) * w + phase   (1, dp)      -- per tile
        rowa = local_row_offset * w                      (rows, dp)   -- grid-invariant input
    the angle is base - rowa, so the tile is sin(base)*cos(rowa) - cos(base)*sin(rowa):
    ~3 VALU ops per element plus 2*dp transcendentals per tile.  f32 math, cast at store.
    """
    i = pl.program_id(0)
    p0 = jnp.float32(x1_built - 1) - (i * tile_global_rows).astype(jnp.float32)
    base = p0 * inv_freq_ref[...] + phase_ref[...]              # (1, dp)
    sin_b = jnp.sin(base)
    cos_b = jnp.cos(base)
    out_ref[...] = (sin_b * cos_row_ref[...] - cos_b * sin_row_ref[...]).astype(out_ref.dtype)


@lru_cache(maxsize=None)
def _cached_pe_table(x1_built, d_model, dtype_name):
    """Build the full symmetric table (2*x1_built - 1, d_model); row j <-> p = x1_built-1-j."""
    dtype = jnp.dtype(dtype_name)
    pe_len = 2 * x1_built - 1

    # Lane-dense packing: fold f consecutive rows into the lane dim when d_model < 128.
    f = 128 // d_model if (d_model < 128 and 128 % d_model == 0) else 1
    dp = f * d_model
    pe_len_packed = pl.cdiv(pe_len, f)

    # Sublane multiple for the output dtype: 8 (4-byte) / 16 (2-byte) / 32 (1-byte).
    row_mult = {4: 8, 2: 16, 1: 32}.get(dtype.itemsize, 8)

    # >= 2 balanced tiles (v7x megacore) for long tables; capped so the two VMEM-resident
    # row tables + double-buffered output stay well inside scoped VMEM on all generations.
    vmem_cap_rows = max(row_mult, ((1 << 20) // dp) // row_mult * row_mult)
    tile_rows_packed = _round_up(pl.cdiv(pe_len_packed, 2), row_mult)
    tile_rows_packed = max(row_mult,
                           min(tile_rows_packed, 1024, vmem_cap_rows,
                               _round_up(pe_len_packed, row_mult)))
    grid = (pl.cdiv(pe_len_packed, tile_rows_packed),)
    tile_global_rows = tile_rows_packed * f

    # Hoisted, grid-invariant f32 tables: per-lane frequency/phase rows and the local-row
    # angle tables.  Constant index_map -> fetched into VMEM once, reused by every tile.
    c = jnp.arange(d_model)
    inv_freq_col = jnp.exp((c // 2).astype(jnp.float32)
                           * jnp.float32(-2.0 * math.log(10000.0) / d_model))
    phase_col = (c % 2).astype(jnp.float32) * jnp.float32(math.pi / 2.0)
    inv_freq_p = jnp.tile(inv_freq_col, f)[None, :]                  # (1, dp)
    phase_p = jnp.tile(phase_col, f)[None, :]                        # (1, dp)

    local_rows = (jnp.arange(tile_rows_packed, dtype=jnp.float32)[:, None] * f
                  + (jnp.arange(dp) // d_model).astype(jnp.float32)[None, :])
    row_angle = local_rows * inv_freq_p                              # (rows, dp)
    sin_row = jnp.sin(row_angle)
    cos_row = jnp.cos(row_angle)

    cost = pl.CostEstimate(
        flops=3 * pe_len_packed * dp,
        transcendentals=2 * dp * grid[0],
        bytes_accessed=(pe_len_packed * dp * dtype.itemsize
                        + 2 * tile_rows_packed * dp * 4 + 2 * dp * 4),
    )

    pe_packed = pl.pallas_call(
        partial(_rel_pos_emb_kernel,
                x1_built=x1_built,
                tile_global_rows=tile_global_rows),
        out_shape=jax.ShapeDtypeStruct((pe_len_packed, dp), dtype),
        grid=grid,
        in_specs=[
            pl.BlockSpec((1, dp), lambda i: (0, 0)),
            pl.BlockSpec((1, dp), lambda i: (0, 0)),
            pl.BlockSpec((tile_rows_packed, dp), lambda i: (0, 0)),
            pl.BlockSpec((tile_rows_packed, dp), lambda i: (0, 0)),
        ],
        out_specs=pl.BlockSpec((tile_rows_packed, dp), lambda i: (i, 0)),
        compiler_params=pltpu.CompilerParams(
            dimension_semantics=("parallel",),
            vmem_limit_bytes=32 * 1024 * 1024,
        ),
        cost_estimate=cost,
    )(inv_freq_p, phase_p, sin_row, cos_row)

    # Unpack lanes back to (pe_len, d_model); one-time cost, result is cached.
    pe = pe_packed.reshape(pe_len_packed * f, d_model)[:pe_len]
    return pe


def rel_positional_encoding(x, left_context=0):
    """JAX/Pallas equivalent of RelPositionalEncoding.forward (eval mode).

    Args:
      x: (batch, time, d_model) array.
      left_context: streaming left context in frames (0 for non-streaming).

    Returns:
      (x, pos_emb) with pos_emb of shape (1, time + left_context + time - 1, d_model)
      in x.dtype.
    """
    _, T, D = x.shape
    x1 = T + left_context
    # Bucket the cache key (power of two, floor 128): one cached table per bucket, like
    # PyTorch's max_len buffer; per-call window is a static slice (no recompiles per T).
    x1_built = max(128, pl.next_power_of_2(x1))
    pe = _cached_pe_table(x1_built, D, jnp.dtype(x.dtype).name)      # (2*x1_built-1, D)
    center = x1_built - 1
    pos_emb = pe[center - x1 + 1: center + T][None]                  # (1, x1 + T - 1, D)
    # Dropout is identity in eval/inference mode (passthrough of x and pos_emb).
    return x, pos_emb


def _reference_pos_emb(T, D, left_context=0, dtype=jnp.float32):
    """Pure-JAX mirror of the PyTorch extend_pe + forward slice (for verification)."""
    x_size_1 = T + left_context
    position = jnp.arange(x_size_1, dtype=jnp.float32)[:, None]
    div_term = jnp.exp(
        jnp.arange(0, D, 2, dtype=jnp.float32) * -(math.log(10000.0) / D)
    )
    pe_pos = jnp.zeros((x_size_1, D), jnp.float32)
    pe_pos = pe_pos.at[:, 0::2].set(jnp.sin(position * div_term))
    pe_pos = pe_pos.at[:, 1::2].set(jnp.cos(position * div_term))
    pe_neg = jnp.zeros((x_size_1, D), jnp.float32)
    pe_neg = pe_neg.at[:, 0::2].set(jnp.sin(-position * div_term))
    pe_neg = pe_neg.at[:, 1::2].set(jnp.cos(-position * div_term))
    pe_pos = jnp.flip(pe_pos, axis=0)[None]
    pe_neg = pe_neg[1:][None]
    pe = jnp.concatenate([pe_pos, pe_neg], axis=1)
    center = pe.shape[1] // 2
    return pe[:, center - x_size_1 + 1: center + T].astype(dtype)


if __name__ == "__main__":
    key = jax.random.PRNGKey(0)
    batch, seq, d_model = 2, 8, 32
    x = jax.random.normal(key, (batch, seq, d_model), dtype=jnp.float32)

    x_out, pos_emb = rel_positional_encoding(x, left_context=0)
    x_out = jax.block_until_ready(x_out)
    pos_emb = jax.block_until_ready(pos_emb)

    # Shape / dtype checks (match PyTorch: (B, T, D) and (1, 2T-1, D), same dtype as x).
    assert x_out.shape == (batch, seq, d_model)
    assert pos_emb.shape == (1, 2 * seq - 1, d_model)
    assert pos_emb.dtype == x.dtype

    # Semantic check against a pure-JAX mirror of the PyTorch reference.  Tolerance
    # reflects f32 angles up to the bucket size (same behavior as PyTorch's max_len
    # buffer), not a kernel bug.
    ref = _reference_pos_emb(seq, d_model)
    assert jnp.allclose(pos_emb, ref, atol=5e-4, rtol=1e-4), "pos_emb mismatch"
    assert jnp.allclose(x_out, x), "x passthrough (eval-mode dropout) mismatch"

    # Multi-tile grid + lane-dense packing (D=64 < 128) + streaming left_context path.
    seq2, d2, lc = 600, 64, 32
    x2 = jax.random.normal(jax.random.PRNGKey(1), (1, seq2, d2), dtype=jnp.float32)
    _, pos_emb2 = rel_positional_encoding(x2, left_context=lc)
    pos_emb2 = jax.block_until_ready(pos_emb2)
    assert pos_emb2.shape == (1, (seq2 + lc) + seq2 - 1, d2)
    ref2 = _reference_pos_emb(seq2, d2, left_context=lc)
    assert jnp.allclose(pos_emb2, ref2, atol=2e-3, rtol=1e-3), "tiled pos_emb mismatch"

    # Same-bucket, different T: reuses the cached table (no new pallas_call compile).
    x2b = jax.random.normal(jax.random.PRNGKey(2), (1, 300, d2), dtype=jnp.float32)
    _, pos_emb2b = rel_positional_encoding(x2b, left_context=lc)
    pos_emb2b = jax.block_until_ready(pos_emb2b)
    assert pos_emb2b.shape == (1, (300 + lc) + 300 - 1, d2)
    ref2b = _reference_pos_emb(300, d2, left_context=lc)
    assert jnp.allclose(pos_emb2b, ref2b, atol=2e-3, rtol=1e-3), "bucketed reuse mismatch"

    # bf16 path: kernel writes bf16 directly (no wrapper-side cast pass).
    x3 = x.astype(jnp.bfloat16)
    _, pos_emb3 = rel_positional_encoding(x3)
    pos_emb3 = jax.block_until_ready(pos_emb3)
    assert pos_emb3.dtype == jnp.bfloat16
    assert jnp.allclose(pos_emb3.astype(jnp.float32), ref, atol=1e-2, rtol=1e-2), \
        "bf16 pos_emb mismatch"

    print("KERNEL_OK")
</pallas_src>

<mosaic_0001>
module attributes {stable_mosaic.version = 11 : i64} {
  func.func @_rel_pos_emb_kernel(%arg0: i32, %arg1: memref<1x128xf32, #tpu.memory_space<vmem>>, %arg2: memref<1x128xf32, #tpu.memory_space<vmem>>, %arg3: memref<32x128xf32, #tpu.memory_space<vmem>>, %arg4: memref<32x128xf32, #tpu.memory_space<vmem>>, %arg5: memref<32x128xf32, #tpu.memory_space<vmem>>) attributes {dimension_semantics = [#tpu.dimension_semantics<parallel>], iteration_bounds = array<i64: 2>, scalar_prefetch = 0 : i64, scratch_operands = 0 : i64, tpu.core_type = #tpu.core_type<tc>, window_params = [{pipeline_mode = #tpu.pipeline_mode<synchronous>, transform_indices = @transform_0, window_bounds = array<i64: 1, 128>}, {pipeline_mode = #tpu.pipeline_mode<synchronous>, transform_indices = @transform_1, window_bounds = array<i64: 1, 128>}, {pipeline_mode = #tpu.pipeline_mode<synchronous>, transform_indices = @transform_2, window_bounds = array<i64: 32, 128>}, {pipeline_mode = #tpu.pipeline_mode<synchronous>, transform_indices = @transform_3, window_bounds = array<i64: 32, 128>}, {transform_indices = @transform_4, window_bounds = array<i64: 32, 128>}]} {
    %c128_i32 = arith.constant 128 : i32
    %0 = arith.muli %arg0, %c128_i32 : i32
    %1 = arith.sitofp %0 : i32 to f32
    %cst = arith.constant 1.270000e+02 : f32
    %2 = arith.subf %cst, %1 : f32
    %c0 = arith.constant 0 : index
    %c0_0 = arith.constant 0 : index
    %3 = vector.load %arg1[%c0, %c0_0] : memref<1x128xf32, #tpu.memory_space<vmem>>, vector<1x128xf32>
    %4 = vector.broadcast %2 : f32 to vector<1x128xf32>
    %5 = arith.mulf %4, %3 : vector<1x128xf32>
    %c0_1 = arith.constant 0 : index
    %c0_2 = arith.constant 0 : index
    %6 = vector.load %arg2[%c0_1, %c0_2] : memref<1x128xf32, #tpu.memory_space<vmem>>, vector<1x128xf32>
    %7 = arith.addf %5, %6 : vector<1x128xf32>
    %8 = math.sin %7 : vector<1x128xf32>
    %9 = math.cos %7 : vector<1x128xf32>
    %c0_3 = arith.constant 0 : index
    %c0_4 = arith.constant 0 : index
    %10 = vector.load %arg4[%c0_3, %c0_4] : memref<32x128xf32, #tpu.memory_space<vmem>>, vector<32x128xf32>
    %11 = vector.broadcast %8 : vector<1x128xf32> to vector<32x128xf32>
    %12 = arith.mulf %11, %10 : vector<32x128xf32>
    %c0_5 = arith.constant 0 : index
    %c0_6 = arith.constant 0 : index
    %13 = vector.load %arg3[%c0_5, %c0_6] : memref<32x128xf32, #tpu.memory_space<vmem>>, vector<32x128xf32>
    %14 = vector.broadcast %9 : vector<1x128xf32> to vector<32x128xf32>
    %15 = arith.mulf %14, %13 : vector<32x128xf32>
    %16 = arith.subf %12, %15 : vector<32x128xf32>
    %c0_7 = arith.constant 0 : index
    %c0_8 = arith.constant 0 : index
    %17 = vector.load %arg5[%c0_7, %c0_8] : memref<32x128xf32, #tpu.memory_space<vmem>>, vector<32x128xf32>
    tpu.vector_store %arg5[%c0_7, %c0_8], %16 {strides = array<i32>} : memref<32x128xf32, #tpu.memory_space<vmem>>, vector<32x128xf32>,
    return
  }
  func.func @transform_0(%arg0: i32) -> (i32, i32) {
    %c0_i32 = arith.constant 0 : i32
    %c0_i32_0 = arith.constant 0 : i32
    %c0_i32_1 = arith.constant 0 : i32
    return %c0_i32, %c0_i32_0 : i32, i32
  }
  func.func @transform_1(%arg0: i32) -> (i32, i32) {
    %c0_i32 = arith.constant 0 : i32
    %c0_i32_0 = arith.constant 0 : i32
    %c0_i32_1 = arith.constant 0 : i32
    return %c0_i32, %c0_i32_0 : i32, i32
  }
  func.func @transform_2(%arg0: i32) -> (i32, i32) {
    %c0_i32 = arith.constant 0 : i32
    %c0_i32_0 = arith.constant 0 : i32
    %c0_i32_1 = arith.constant 0 : i32
    return %c0_i32, %c0_i32_0 : i32, i32
  }
  func.func @transform_3(%arg0: i32) -> (i32, i32) {
    %c0_i32 = arith.constant 0 : i32
    %c0_i32_0 = arith.constant 0 : i32
    %c0_i32_1 = arith.constant 0 : i32
    return %c0_i32, %c0_i32_0 : i32, i32
  }
  func.func @transform_4(%arg0: i32) -> (i32, i32) {
    %c0_i32 = arith.constant 0 : i32
    %c0_i32_0 = arith.constant 0 : i32
    return %arg0, %c0_i32 : i32, i32
  }
}

</mosaic_0001>

<bundles_post_ra>
// kernel: tpu_custom_call.1
= control target key start
LH: loop header
LB: loop body
LE: loop exit
PB: predicated region body
PF: predicated region fallthrough
CT: control target
= control target key end

     0   :  { %9 = vsyncpa [#allocation3], 0  ;;  %s1107_s0 = inlined_call_operand.hbm [shape: f32[1,128], index: 0, kind: input, shape index: {}]   ;;  %s1108_s1 = inlined_call_operand.vmem [shape: f32[1,128], index: 1, kind: input, shape index: {}]   ;;  %s1109_s2 = inlined_call_operand.hbm [shape: f32[32,128], index: 2, kind: input, shape index: {}]   ;;  %s1110_s3 = inlined_call_operand.hbm [shape: f32[32,128], index: 3, kind: input, shape index: {}]   ;;  %s1111_s4 = inlined_call_operand.hbm [shape: f32[64,128], index: 4, kind: output, shape index: {}]  }
   0x1   :  { %10 = vsyncpa [#allocation6], 0 }
   0x2   :  { %11 = vsyncpa [#allocation4], 0 }
   0x3   :  { %13 = vsyncpa [#allocation4 + $0x1], 0  ;;  %s873_s15 = smov 0   ;;  %s875_s16 = smov 0  }
   0x4   :  { %s877_s17 = smov 0   ;;  %s879_s18 = smov 0  }
   0x5 LB: > { %s894_s19 = sadd.s32 4294967295, %s832_s18   ;;  %s565_s20 = sadd.s32 4294967294, %s832_s18   ;;  %s832_s18 = sphi %s879_s18, %s1130_s18   ;;  %s828_s17 = sphi %s877_s17, %s1129_s17   ;;  %s824_s16 = sphi %s875_s16, %s1128_s16   ;;  %s820_s15 = sphi %s873_s15, %s1127_s15  }
   0x6   : > { %s898_s21 = sadd.s32 1, %s832_s18   ;;  %s110_s22 = sadd.s32 1, %s828_s17 }
   0x7   : > { %s107_s23 = ssub.s32 %s832_s18, %s898_s21  ;;  %p120_p0 = scmp.ne.s32.totalorder %s828_s17, %s824_s16 }
   0x8   : > { %p108_p1 = scmp.eq.s32.totalorder %s107_s23, 0  ;;  %p121_p2 = scmp.eq.s32.totalorder %s894_s19, 1 }
   0x9   : > { %p126_p3 = scmp.ne.s32.totalorder %s824_s16, %s820_s15  ;;  %p127_p4 = scmp.eq.s32.totalorder %s565_s20, 1 }
   0xa   : > { %s909_s24 = scalar_select %p108_p1, %s828_s17, %s110_s22  }
   0xb   : > { %p911_p5 = por %p121_p2, %p120_p0  ;;  %p915_p6 = por %p127_p4, %p126_p3 }
   0xc   : > { %p566_p7 = scmp.ge.s32.totalorder %s832_s18, 1  ;;  %p134_p8 = scmp.lt.s32.totalorder %s832_s18, 3 }
   0xd   : > { %s1115_s25 = scalar_select %p911_p5, 1, 0 }
   0xe   : > { %s1116_s26 = scalar_select %p915_p6, 1, 0 }
   0xf   : > { %p1112_p9 = scmp.eq.s32.totalorder %s894_s19, 0  ;;  %p922_p10 = pnand %p566_p7, %p134_p8 }
  0x10   : > { %s834_s28 = smov [#allocation5]   ;;  %s835_s5 = smov [#allocation2]  }
  0x11   : > { %s1117_s27 = scalar_select %p922_p10, 1, 0 }
  0x12   : > { %s160_s29 = sshll.u32 %s834_s28, 4  ;;  %p608_p11 = pneg %p922_p10  ;;  %s928_s29 = int_to_ptr.vmem [resolvable:$true] %s160_s29 }
  0x13   : > { %s147_s6 = sshll.u32 %s835_s5, 4  ;;  %s836_s7 = smov [#allocation7]   ;;  %s936_s6 = int_to_ptr.vmem [resolvable:$true] %s147_s6 }
  0x14   : > { %p932_p12 = pnand %p1112_p9, %p608_p11  ;;  %s938_s8 = sshll.u32 %s836_s7, 4  ;;  %s174_s8 = int_to_ptr.vmem [resolvable:$true] %s938_s8 }
  0x15   : > { %s678_s11 = scalar_lea.hbm %s1109_s2, 512 }
  0x16   : > { %p679_p13 = scmp.ne.s32.totalorder %s1109_s2, %s678_s11  ;;  %p948_p0 = pneg %p932_p12 }
  0x17   : > { %p685_p3 = scmp.lt.u32.totalorder %s678_s11, %s1109_s2 }
  0x18   : > { %p681_p1 = pnand %p948_p0, %p679_p13 }
  0x1a   : > { %p682_p2 = pneg %p681_p1 }
  0x1c   : > { %p687_p4 = pnand %p685_p3, %p682_p2 }
  0x1e   : > { %690 = shalt.err (!%p687_p4)
}
  0x1f   : > { %s691_s23 = scalar_lea.vmem %s928_s29, 512  ;;  %p699_p9 = scmp.lt.s32.totalorder %s928_s29, %s928_s29 }
  0x20   : > { %p692_p7 = scmp.ne.s32.totalorder %s928_s29, %s691_s23  ;;  %p700_p6 = scmp.lt.s32.totalorder %s691_s23, %s691_s23 }
  0x22   : > { %p694_p8 = pnand %p692_p7, %p948_p0  ;;  %p701_p13 = por %p700_p6, %p699_p9 }
  0x24   : > { %p695_p11 = pneg %p694_p8 }
  0x26   : > { %p702_p1 = pnand %p701_p13, %p695_p11 }
  0x28   : > { %705 = shalt.err (!%p702_p1)
}
  0x29   : > { %s837_s28 = smov 128   ;;  %s838_s5 = smov 8  }
  0x2a   : > { %614 = dma.hbm_to_vmem [thread:$0]  (!%p932_p12), %s1109_s2, 512, %s928_s29, [#allocation6], %s837_s28, %s837_s28, %s838_s5  }
  0x2b   : > { %s706_s12 = scalar_lea.hbm %s1107_s0, 16 }
  0x2c   : > { %p707_p6 = scmp.ne.s32.totalorder %s1107_s0, %s706_s12  ;;  %p713_p3 = scmp.lt.u32.totalorder %s706_s12, %s1107_s0 }
  0x2e   : > { %p709_p9 = pnand %p707_p6, %p948_p0 }
  0x30   : > { %p710_p2 = pneg %p709_p9 }
  0x32   : > { %p715_p4 = pnand %p713_p3, %p710_p2 }
  0x34   : > { %718 = shalt.err (!%p715_p4)
}
  0x35   : > { %s719_s29 = scalar_lea.vmem %s936_s6, 16  ;;  %s726_s7 = scalar_lea.vmem %s936_s6, 32 }
  0x36   : > { %p720_p7 = scmp.ne.s32.totalorder %s936_s6, %s719_s29  ;;  %p727_p13 = scmp.lt.s32.totalorder %s936_s6, %s936_s6 }
  0x37   : > { %p728_p1 = scmp.lt.s32.totalorder %s726_s7, %s719_s29 }
  0x38   : > { %p722_p8 = pnand %p720_p7, %p948_p0 }
  0x39   : > { %p729_p6 = por %p728_p1, %p727_p13 }
  0x3a   : > { %p723_p11 = pneg %p722_p8 }
  0x3c   : > { %p730_p9 = pnand %p729_p6, %p723_p11 }
  0x3e   : > { %733 = shalt.err (!%p730_p9)
}
  0x3f   : > { %611 = dma.hbm_to_vmem [thread:$0]  (!%p932_p12), %s1107_s0, 16, %s936_s6, [#allocation3]  }
  0x40   : > { %s734_s13 = scalar_lea.hbm %s1110_s3, 512 }
  0x41   : > { %p735_p2 = scmp.ne.s32.totalorder %s1110_s3, %s734_s13  ;;  %p741_p7 = scmp.lt.u32.totalorder %s734_s13, %s1110_s3 }
  0x43   : > { %p737_p3 = pnand %p735_p2, %p948_p0 }
  0x45   : > { %p738_p4 = pneg %p737_p3 }
  0x47   : > { %p743_p8 = pnand %p741_p7, %p738_p4 }
  0x49   : > { %746 = shalt.err (!%p743_p8)
}
  0x4a   : > { %s747_s7 = scalar_lea.vmem %s174_s8, 512  ;;  %p755_p6 = scmp.lt.s32.totalorder %s174_s8, %s174_s8 }
  0x4b   : > { %p748_p11 = scmp.ne.s32.totalorder %s174_s8, %s747_s7  ;;  %p756_p9 = scmp.lt.s32.totalorder %s747_s7, %s747_s7 }
  0x4d   : > { %p750_p13 = pnand %p748_p11, %p948_p0  ;;  %p757_p5 = por %p756_p9, %p755_p6 }
  0x4f   : > { %p751_p1 = pneg %p750_p13 }
  0x51   : > { %p758_p10 = pnand %p757_p5, %p751_p1 }
  0x53   : > { %761 = shalt.err (!%p758_p10)
}
  0x54   : > { %617 = dma.hbm_to_vmem [thread:$0]  (!%p932_p12), %s1110_s3, 512, %s174_s8, [#allocation6], %s837_s28, %s837_s28, %s838_s5  }
  0x55   : > { %p1120_p2 = scmp.ne.s32.totalorder %s1117_s27, 0 }
  0x56   : > { %p1121_p0 = scmp.eq.s32.totalorder (!%p1120_p2), %s894_s19, 0 }
  0x57   : > { %189 = sbr.rel (%p1120_p2) target bundleno = 210 (0xd2), region = 36 }
  0x5e   : > { %807 = dma.done.wait (%p1121_p0), [#allocation3], 16   ;;  %p1122_p3 = pmov %p1121_p0 }
  0x5f   : > { %p1123_p5 = pmov %p1121_p0 }
  0x60   : > { %809 = vsyncadd (%p1122_p3), [#allocation3], 4294967280 }
  0x61   : > { %811 = dma.done.wait (%p1123_p5), [#allocation6], 1024   ;;  %p1124_p10 = pmov %p1121_p0 }
  0x62   : > { %s575_s30 = sshll.u32 %s894_s19, 7  ;;  %v222_v1 = vld [vmem:[#allocation2] sm:$0x1]  ;;  %v839_v16 = vmov 683565275   ;;  %s215_s28 = sand.u32 1, %s824_s16  }
  0x63   : > { %813 = vsyncadd (%p1124_p10), [#allocation6], 4294966272  ;;  %s220_s14 = scvt.s32.f32 %s575_s30  ;;  %v225_v2 = vld [vmem:[%s1108_s1] sm:$0x1]  ;;  %v840_v18 = vmov 2475754826  }
  0x64   : > { %v841_v20 = vmov 2131351028   ;;  %v842_v22 = vmov 2102212464   ;;  %v843_v24 = vmov 920167782  }
  0x65   : > { %s221_s10 = ssub.f32 127.0, %s220_s14  ;;  %v844_v31 = vmov 1326507024   ;;  %s574_s5 = sshll.u32 %s215_s28, 5 }
  0x66   : > { %s217_s11 = scalar_lea.vmem [#allocation8], %s574_s5  ;;  %s589_s13 = sshll.u32 %s894_s19, 9 }
  0x67   : > { %v223_v0 = vstv %s221_s10  ;;  %s484_s12 = sshll.u32 %s217_s11, 4  ;;  %s1062_s19 = scalar_lea.hbm %s1111_s4, %s589_s13  ;;  %s1057_s12 = int_to_ptr.vmem [resolvable:$true] %s484_s12 }
  0x68   : > { %v224_v3 = vmul.f32 %v223_v0, %v222_v1  ;;  %s1066_s23 = scalar_lea.sflag [#allocation4], %s215_s28  ;;  %s762_s29 = scalar_lea.vmem %s1057_s12, 512 }
  0x69   : > { %p763_p12 = scmp.ne.s32.totalorder %s1057_s12, %s762_s29  ;;  %p1125_p4 = scmp.ne.s32.totalorder %s1115_s25, 0 }
  0x6a   : > { %v1032_v4 = vadd.f32 %v225_v2, %v224_v3  ;;  %s845_s7 = smov [#allocation8]  }
  0x6b   : > { %p764_p7 = pnand %p763_p12, %p1125_p4  ;;  %s766_s6 = sshll.u32 %s845_s7, 4  ;;  %s767_s6 = int_to_ptr.vmem [resolvable:$false] %s766_s6 }
  0x6c   : > { %v230_v5 = vand.u32 2139095040, %v1032_v4  ;;  %v227_v7 = vand.u32 2147483647, %v1032_v4  ;;  %vm229_vm7 = vcmp.lt.s32.totalorder %v1032_v4, 0  ;;  %vm319_vm15 = vweird.f32 %v1032_v4  ;;  %s768_s9 = scalar_lea.vmem %s767_s6, 1024  ;;  %p769_p11 = scmp.lt.s32.totalorder %s1057_s12, %s767_s6 }
  0x6d   : > { %p765_p8 = pneg %p764_p7  ;;  %p770_p13 = scmp.lt.s32.totalorder %s768_s9, %s762_s29 }
  0x6e   : > { %v231_v6 = vshrl.u32 %v230_v5, 23  ;;  %v234_v10 = vand.u32 8388607, %v227_v7  ;;  %vm228_vm8 = vcmp.le.f32.partialorder %v227_v7, 0.7853982 }
  0x6f   : > { %p771_p1 = por %p770_p13, %p769_p11 }
  0x70   : > { %v576_v8 = vadd.s32 4294967169, %v231_v6  ;;  %v235_v13 = vor.u32 8388608, %v234_v10 }
  0x71   : > { %p772_p6 = pnand %p771_p1, %p765_p8 }
  0x72   : > { %v237_v9 = vadd.s32 1, %v576_v8  ;;  %v275_v33 = vshll.u32 %v235_v13, 8 }
  0x74   : > { %vm238_vm0 = vcmp.gt.s32.totalorder %v237_v9, 0 }
  0x75   : > { %v239_v11 = vsel %vm238_vm0, %v237_v9, 0 }
  0x76   : > { %v241_v12 = vand.u32 31, %v239_v11  ;;  %v240_v14 = vshrl.u32 %v239_v11, 5 }
  0x78   : > { %v242_v15 = vsub.s32 32, %v241_v12  ;;  %v244_v17 = vshll.u32 %v839_v16, %v241_v12  ;;  %v247_v19 = vshll.u32 %v840_v18, %v241_v12  ;;  %v250_v21 = vshll.u32 %v841_v20, %v241_v12 }
  0x79   : > { %v253_v23 = vshll.u32 %v842_v22, %v241_v12  ;;  %v256_v25 = vshll.u32 %v843_v24, %v241_v12  ;;  %vm259_vm1 = vcmp.lt.s32.totalorder %v240_v14, 1  ;;  %vm262_vm2 = vcmp.lt.s32.totalorder %v240_v14, 4 }
  0x7a   : > { %v243_v26 = vshrl.u32 %v839_v16, %v242_v15  ;;  %v245_v27 = vshrl.u32 %v840_v18, %v242_v15  ;;  %v248_v28 = vshrl.u32 %v841_v20, %v242_v15  ;;  %v251_v29 = vshrl.u32 %v842_v22, %v242_v15 }
  0x7b   : > { %v254_v30 = vshrl.u32 %v843_v24, %v242_v15  ;;  %v257_v32 = vshrl.u32 %v844_v31, %v242_v15  ;;  %vm260_vm3 = vcmp.lt.s32.totalorder %v240_v14, 2  ;;  %vm261_vm4 = vcmp.lt.s32.totalorder %v240_v14, 3 }
  0x7c   : > { %v246_v34 = vor.u32 %v245_v27, %v244_v17  ;;  %v249_v35 = vor.u32 %v248_v28, %v247_v19  ;;  %v252_v36 = vor.u32 %v251_v29, %v250_v21 }
  0x7d   : > { %v255_v37 = vor.u32 %v254_v30, %v253_v23  ;;  %v258_v38 = vor.u32 %v257_v32, %v256_v25  ;;  %v439_v25 = vlaneseq }
  0x7e   : > { %v263_v39 = vsel %vm259_vm1, %v243_v26, %v246_v34  ;;  %v264_v40 = vsel %vm262_vm2, %v252_v36, 2102212464  ;;  %v267_v41 = vsel %vm259_vm1, %v246_v34, %v249_v35  ;;  %v271_v42 = vsel %vm259_vm1, %v249_v35, %v252_v36 }
  0x7f   : > { %v265_v43 = vsel %vm261_vm4, %v249_v35, %v264_v40  ;;  %v268_v44 = vsel %vm262_vm2, %v255_v37, 920167782  ;;  %v272_v45 = vsel %vm262_vm2, %v258_v38, 1326507024  ;;  %v440_v28 = vshrl.u32 %v439_v25, 7  ;;  %v448_v40 = vld [vmem:[#allocation5] sm:$0xff] }
  0x80   : > { %v269_v46 = vsel %vm261_vm4, %v252_v36, %v268_v44  ;;  %v273_v47 = vsel %vm261_vm4, %v255_v37, %v272_v45  ;;  %v266_v48 = vsel %vm260_vm3, %v263_v39, %v265_v43  ;;  %v434_v39 = vld [vmem:[#allocation7] sm:$0xff]  ;;  %v435_v43 = vld [vmem:[#allocation7 + $0x8] sm:$0xff]  ;;  %v436_v45 = vld [vmem:[#allocation7 + $0x10] sm:$0xff] }
  0x81   : > { %v270_v49 = vsel %vm260_vm3, %v267_v41, %v269_v46  ;;  %v274_v50 = vsel %vm260_vm3, %v271_v42, %v273_v47  ;;  %v282_v55 = vmul.u32 %v275_v33, %v266_v48  ;;  %v441_v34 = vsub.s32 0, %v440_v28  ;;  %v449_v44 = vld [vmem:[#allocation5 + $0x8] sm:$0xff]  ;;  %v450_v48 = vld [vmem:[#allocation5 + $0x10] sm:$0xff] }
  0x82   : > { %v1038_v51 = vmul.u32.u64.low %v275_v33, %v274_v50  ;;  %v1039_v52 = vmul.u32.u64.high %v275_v33, %v274_v50, %v1038_v51  ;;  %v1041_v53 = vmul.u32.u64.low %v275_v33, %v270_v49  ;;  %v1042_v54 = vmul.u32.u64.high %v275_v33, %v270_v49, %v1041_v53  ;;  %v437_v49 = vld [vmem:[#allocation7 + $0x18] sm:$0xff] }
  0x84   : > { %vm284_vm5 = vc.u32 %v1039_v52, %v1041_v53  ;;  %v285_v56 = vadd.s32 1, %v1042_v54  ;;  %v283_v3 = vadd.s32 %v1041_v53, %v1039_v52 }
  0x86   : > { %v286_v57 = vsel %vm284_vm5, %v285_v56, %v1042_v54 }
  0x87   : > { %v287_v58 = vadd.s32 %v286_v57, %v282_v55 }
  0x89   : > { %v288_v59 = vadd.s32 536870912, %v287_v58 }
  0x8b   : > { %v289_v60 = vshrl.u32 %v288_v59, 30 }
  0x8d   : > { %v290_v61 = vshll.u32 %v289_v60, 30  ;;  %v313_v17 = vsub.s32 4, %v289_v60 }
  0x8f   : > { %v291_v62 = vsub.s32 %v287_v58, %v290_v61  ;;  %v314_v20 = vsel %vm229_vm7, %v313_v17, %v289_v60 }
  0x90   : > { %v316_v23 = vsel %vm228_vm8, 0, %v314_v20 }
  0x91   : > { %v293_v63 = vsub.s32 0, %v291_v62  ;;  %v320_v24 = vadd.s32 3, %v316_v23  ;;  %v424_v27 = vand.u32 3, %v316_v23 }
  0x93   : > { %v577_v0 = vmin.u32 %v293_v63, %v291_v62  ;;  %v321_v26 = vand.u32 3, %v320_v24  ;;  %vm429_vm10 = vcmp.eq.s32.totalorder %v424_v27, 2  ;;  %vm426_vm12 = vcmp.eq.s32.totalorder %v424_v27, 0 }
  0x94   : > { %vm425_vm14 = vcmp.lt.s32.totalorder %v424_v27, 2 }
  0x95   : > { %v295_v1 = vclz %v577_v0  ;;  %vm326_vm9 = vcmp.eq.s32.totalorder %v321_v26, 2  ;;  %vm323_vm11 = vcmp.eq.s32.totalorder %v321_v26, 0  ;;  %vm322_vm13 = vcmp.lt.s32.totalorder %v321_v26, 2 }
  0x97   : > { %v578_v2 = vadd.s32 4294967294, %v295_v1 }
  0x99   : > { %vm579_vm6 = vcmp.lt.s32.totalorder %v578_v2, 0 }
  0x9a   : > { %v298_v5 = vsel %vm579_vm6, 0, %v578_v2 }
  0x9b   : > { %v299_v6 = vsub.s32 32, %v298_v5  ;;  %v300_v8 = vshll.u32 %v291_v62, %v298_v5  ;;  %v303_v9 = vsub.s32 4294967266, %v298_v5 }
  0x9d   : > { %v301_v10 = vshrl.u32 %v283_v3, %v299_v6  ;;  %v304_v11 = vadd.s32 127, %v303_v9 }
  0x9f   : > { %v302_v12 = vor.u32 %v301_v10, %v300_v8  ;;  %v305_v13 = vshll.u32 %v304_v11, 23 }
  0xa1   : > { %v306_v14 = vor.u32 4788187, %v305_v13  ;;  %v309_v15 = vcvt.s32.f32 %v302_v12 }
  0xa3   : > { %v307_v16 = vand.u32 2147483647, %v306_v14 }
  0xa5   : > { %v310_v18 = vmul.f32 %v309_v15, %v307_v16 }
  0xa7   : > { %v311_v19 = vxor.u32 2147483648, %v310_v18 }
  0xa9   : > { %v312_v21 = vsel %vm229_vm7, %v311_v19, %v310_v18 }
  0xaa   : > { %v315_v22 = vsel %vm228_vm8, %v1032_v4, %v312_v21  ;;  %v451_v4 = vld [vmem:[#allocation5 + $0x18] sm:$0xff] }
  0xab   : > { %674 = vcosq.f32 %v315_v22 }
  0xac   : > { %676 = vsinq.f32 %v315_v22 }
  0xb5   : > { %v675_v29 = vpop.eup %674 }
  0xb6   : > { %v677_v30 = vpop.eup %676  ;;  %v327_v7 = vxor.u32 2147483648, %v675_v29 }
  0xb7   : > { %v324_v31 = vxor.u32 2147483648, %v677_v30 }
  0xb8   : > { %v328_v32 = vsel %vm326_vm9, %v327_v7, %v677_v30  ;;  %v431_v33 = vsel %vm429_vm10, %v327_v7, %v677_v30 }
  0xb9   : > { %v325_v35 = vsel %vm323_vm11, %v675_v29, %v324_v31  ;;  %v428_v36 = vsel %vm426_vm12, %v675_v29, %v324_v31 }
  0xba   : > { %v329_v37 = vsel %vm322_vm13, %v325_v35, %v328_v32  ;;  %v432_v38 = vsel %vm425_vm14, %v428_v36, %v431_v33 }
  0xbb   : > { %v330_v41 = vsel %vm319_vm15, nan, %v329_v37  ;;  %v433_v42 = vsel %vm319_vm15, nan, %v432_v38 }
  0xbc   : > { %v442_v46 = vrot.slane %v330_v41, %v441_v34  ;;  %v456_v47 = vrot.slane %v433_v42, %v441_v34 }
  0xbe   : > { %v444_v50 = vmul.f32 %v442_v46, %v434_v39  ;;  %v458_v51 = vmul.f32 %v456_v47, %v448_v40  ;;  %v445_v52 = vmul.f32 %v442_v46, %v435_v43  ;;  %v459_v53 = vmul.f32 %v456_v47, %v449_v44 }
  0xbf   : > { %v446_v54 = vmul.f32 %v442_v46, %v436_v45  ;;  %v460_v55 = vmul.f32 %v456_v47, %v450_v48  ;;  %v447_v56 = vmul.f32 %v442_v46, %v437_v49  ;;  %v461_v57 = vmul.f32 %v456_v47, %v451_v4 }
  0xc0   : > { %v462_v58 = vsub.f32 %v444_v50, %v458_v51  ;;  %v463_v59 = vsub.f32 %v445_v52, %v459_v53 }
  0xc1   : > { %v464_v60 = vsub.f32 %v446_v54, %v460_v55  ;;  %v465_v61 = vsub.f32 %v447_v56, %v461_v57 }
  0xc2   : > { %466 = vst [vmem:[%s217_s11] sm:$0xff] %v462_v58  ;;  %467 = vst [vmem:[%s217_s11 + $0x8] sm:$0xff] %v463_v59 }
  0xc3   : > { %468 = vst [vmem:[%s217_s11 + $0x10] sm:$0xff] %v464_v60  ;;  %469 = vst [vmem:[%s217_s11 + $0x18] sm:$0xff] %v465_v61 }
  0xc4   : > { %775 = shalt.err (!%p772_p6)
}
  0xc5   : > { %s776_s30 = scalar_lea.hbm %s1062_s19, 512  ;;  %s780_s27 = scalar_lea.hbm %s1111_s4, 1024 }
  0xc6   : > { %p777_p9 = scmp.ne.s32.totalorder %s1062_s19, %s776_s30  ;;  %p781_p3 = scmp.lt.u32.totalorder %s1062_s19, %s1111_s4 }
  0xc7   : > { %p782_p5 = scmp.lt.u32.totalorder %s780_s27, %s776_s30  ;;  %p784_p12 = scmp.lt.u32.totalorder %s776_s30, %s1062_s19 }
  0xc8   : > { %p778_p2 = pnand %p777_p9, %p1125_p4 }
  0xc9   : > { %p783_p10 = por %p782_p5, %p781_p3 }
  0xca   : > { %p779_p0 = pneg %p778_p2 }
  0xcb   : > { %p785_p7 = por %p784_p12, %p783_p10 }
  0xcd   : > { %p786_p8 = pnand %p785_p7, %p779_p0 }
  0xcf   : > { %789 = shalt.err (!%p786_p8)
}
  0xd0   : > { %s846_s5 = smov 128   ;;  %s847_s11 = smov 8  }
  0xd1   : > { %606 = dma.vmem_to_hbm [thread:$0]  (%p1125_p4), %s1057_s12, 512, %s1062_s19, %s1066_s23, %s846_s5, %s846_s5, %s847_s11  }
  0xd2 PF: > { %p628_p11 = scmp.ge.s32.totalorder %s832_s18, 2  ;;  %s499_s13 = sand.u32 1, %s820_s15  }
  0xd3   : > { %p1126_p13 = scmp.ne.s32.totalorder %s1116_s26, 0  ;;  %s500_s20 = scalar_lea.sflag [#allocation4], %s499_s13 }
  0xd5   : > { %p619_p1 = pnand %p628_p11, %p1126_p13 }
  0xd7   : > { %815 = dma.done.wait (!%p619_p1), %s500_s20, 512  }
  0xd8   : > { %817 = vsyncadd (!%p619_p1), %s500_s20, 4294966784  ;;  %p16_p6 = scmp.ge.s32.totalorder %s898_s21, 4   ;;  %s1127_s15 = smov %s824_s16 }
  0xd9   : > { %s1128_s16 = smov %s828_s17  ;;  %s1129_s17 = smov %s909_s24 }
  0xda   : > { %s1130_s18 = smov %s898_s21  ;;  %18 = sbr.rel (!%p16_p6) target bundleno = 5 (0x5), region = 81 }
  0xe1   :  { %505 = vsyncpa [#allocation3], 1 }
  0xe2   :  { %507 = vsyncpa [#allocation3 + $0x1], 1 }
  0xe3   :  { %508 = vsyncpa [#allocation6], 1 }
  0xe4   :  { %509 = vsyncpa [#allocation4], 1 }
  0xe5   :  { %511 = vsyncpa [#allocation4 + $0x1], 1 }

</bundles_post_ra>
